<compile_context>
chip_gen: v7x
topology: tpu7x:2x2x1
jax: 0.10.0
libtpu: 0.0.40
codegen_flags: <defaults>
</compile_context>

<pallas_src>
import jax
import jax.numpy as jnp
from jax import lax
from jax.experimental import pallas as pl
from jax.experimental.pallas import tpu as pltpu

# ----- synthetic config (consistent with GlobalLocalBlock.__init__) ----------
BASE_FEAT_DIM = 16                       # cfg.MODEL.BASE_FEAT_DIM
WINDOW_SIZE = 64                         # cfg.DATASET.WINDOW_SIZE
SAMPLE_STRIDE = 1                        # cfg.DATASET.SAMPLE_STRIDE
DROP_THRESHOLD = 0.05                    # cfg.MODEL.DROP_THRESHOLD
B = 2                                    # batch
L = 16                                   # ori_length (sequence length)
C = BASE_FEAT_DIM // 2                   # channels after `down` conv   (= 8)
LT = WINDOW_SIZE // (SAMPLE_STRIDE * L)  # length_temp                  (= 4)
HID = 4 * C                              # conv1 hidden dim             (= 32)
EPS = 1e-5                               # F.layer_norm default eps


def _make_kernel(group, length, c, lt, hid, dim, col_offs,
                 drop_threshold, eps):
    """Build a kernel processing `group` samples per grid step."""
    half = lt // 2
    scale = float(c) ** -0.5
    inv_n = 1.0 / float(c * length)
    o_down, o_pg, o_lg, o_c1, o_c2, o_up = col_offs[:6]

    def kernel(x_ref, w_ref, b_ref, out_ref):
        def mm(w, h):
            return jnp.dot(w, h, preferred_element_type=jnp.float32)

        # ---- unpack the packed weight / bias slabs (static slices) ---------
        w_all = w_ref[...]                               # (32, 80)
        b_all = b_ref[...]                               # (32, 6)
        w_down = w_all[0:c,     o_down:o_down + dim]
        w_pg   = w_all[0:2 * c, o_pg:o_pg + c]           # fused phi & g
        w_lg   = w_all[0:c,     o_lg:o_lg + c]
        w_c1   = w_all[0:hid,   o_c1:o_c1 + c]
        w_c2   = w_all[0:c,     o_c2:o_c2 + hid]
        w_up   = w_all[0:dim,   o_up:o_up + c]
        b_down = b_all[0:c,     0:1]
        b_pg   = b_all[0:2 * c, 1:2]
        b_lg   = b_all[0:c,     2:3]
        b_c1   = b_all[0:hid,   3:4]
        b_c2   = b_all[0:c,     4:5]
        b_up   = b_all[0:dim,   5:6]

        x = x_ref[0]                                     # (dim, group*length)

        # down projection + residual (one matmul over all samples)
        xr = mm(w_down, x) + b_down                      # (c, group*length)
        residual = xr

        # fused phi / g 1x1 convs: one (2c, c) matmul, then split.
        pg = mm(w_pg, xr) + b_pg                         # (2c, group*length)
        phi = pg[0:c]
        g = pg[c:2 * c]
        # TODO(synk): nn.Dropout(p=0.3) layers are identity (eval semantics).
        g_thr = jnp.where(g < drop_threshold, 0.0, g)

        # channel-window band mask (shared by all samples):
        # window slot w of row ch maps to channel ch + w - lt//2.
        row = lax.broadcasted_iota(jnp.int32, (c, c), 0)
        col = lax.broadcasted_iota(jnp.int32, (c, c), 1)
        dlt = col - row + half
        band = (dlt >= 0) & (dlt < lt)                   # (c, c)
        n_in = jnp.sum(band.astype(jnp.float32), axis=1, keepdims=True)
        n_oob = float(lt) - n_in                         # zero-padded slots
        has_oob = n_oob > 0.0

        # ---- local channel-window attention, per sample (MXU matmuls) ------
        parts = []
        for s in range(group):
            sl = slice(s * length, (s + 1) * length)
            phi_s = phi[:, sl]                           # (c, length)
            g_s = g[:, sl]
            # S[ch, k] = <phi[ch, :], g[k, :]>  (banded entries = scores)
            s_full = lax.dot_general(
                phi_s, g_s, (((1,), (1,)), ((), ())),
                preferred_element_type=jnp.float32) * scale
            s_band = jnp.where(band, s_full, -1e30)
            m_in = jnp.max(s_band, axis=1, keepdims=True)
            # out-of-range window slots carry score exactly 0 (zero padding).
            m = jnp.where(has_oob, jnp.maximum(m_in, 0.0), m_in)
            e = jnp.exp(s_band - m)                      # off-band -> exp(-big)=0
            denom = (jnp.sum(e, axis=1, keepdims=True)
                     + n_oob * jnp.exp(-jnp.maximum(m, 0.0)))
            p = e * pl.reciprocal(denom, approx=True)    # banded softmax probs
            parts.append(mm(p, g_thr[:, sl]))            # (c, length)
        local_temp = parts[0] if group == 1 else jnp.concatenate(parts, axis=1)

        # per-sample LayerNorm over (c, length); one-pass sum / sum-of-squares.
        def layer_norm(a):
            outs = []
            for s in range(group):
                seg = a[:, s * length:(s + 1) * length]
                s1 = jnp.sum(seg)
                s2 = jnp.sum(seg * seg)
                mu = s1 * inv_n
                var = jnp.maximum(s2 * inv_n - mu * mu, 0.0)
                outs.append((seg - mu) * lax.rsqrt(var + eps))
            return outs[0] if group == 1 else jnp.concatenate(outs, axis=1)

        ln1 = layer_norm(mm(w_lg, local_temp) + b_lg + residual)

        # MLP: conv1 -> Mish -> conv2 -> residual -> LayerNorm
        h = mm(w_c1, ln1) + b_c1                         # (hid, group*length)
        softplus = jnp.maximum(h, 0.0) + jnp.log1p(jnp.exp(-jnp.abs(h)))
        h = h * jnp.tanh(softplus)                       # Mish
        h2 = mm(w_c2, h) + b_c2                          # (c, group*length)

        ln2 = layer_norm(h2 + ln1)
        out_ref[0] = mm(w_up, ln2) + b_up                # (dim, group*length)

    return kernel


def global_local_block(x, params, samples_per_step=None):
    """GlobalLocalBlock.forward.  x: (B, dim_in, L) -> (B, dim_in, L).

    The whole batch is flattened onto the lane axis and processed in a single
    grid step by default.  On v7x, pass samples_per_step = batch // 2 to get a
    2-wide "parallel" grid (one sample group per TensorCore).
    """
    b_, dim, l_ = x.shape
    (w_down, b_down, w_phi, b_phi, w_g, b_g,
     w_lg, b_lg, w_c1, b_c1, w_c2, b_c2, w_up, b_up) = params
    c = w_down.shape[0]
    hid = w_c1.shape[0]
    lt = WINDOW_SIZE // (SAMPLE_STRIDE * l_)
    group = b_ if samples_per_step is None else samples_per_step
    assert b_ % group == 0
    n_steps = b_ // group

    # ---- pack 14 params into 2 operands (weight slab + bias slab); fuse the
    #      phi & g weights/biases so they share a single matmul. --------------
    w_pg = jnp.concatenate([w_phi, w_g], axis=0)         # (2c, c)
    b_pg = jnp.concatenate([b_phi, b_g], axis=0)         # (2c, 1)
    weights = [w_down, w_pg, w_lg, w_c1, w_c2, w_up]
    biases = [b_down, b_pg, b_lg, b_c1, b_c2, b_up]
    rows = max(w.shape[0] for w in weights)
    col_offs = [0]
    for w in weights:
        col_offs.append(col_offs[-1] + w.shape[1])
    w_slab = jnp.zeros((rows, col_offs[-1]), jnp.float32)
    for w, off in zip(weights, col_offs[:-1]):
        w_slab = w_slab.at[:w.shape[0], off:off + w.shape[1]].set(w)
    b_slab = jnp.zeros((rows, len(biases)), jnp.float32)
    for j, bias in enumerate(biases):
        b_slab = b_slab.at[:bias.shape[0], j].set(bias[:, 0])

    # ---- flatten each sample group onto the lane axis:
    #      (B, dim, L) -> (n_steps, dim, group*L) -----------------------------
    x3 = (x.reshape(n_steps, group, dim, l_)
           .transpose(0, 2, 1, 3)
           .reshape(n_steps, dim, group * l_))

    kernel = _make_kernel(group, l_, c, lt, hid, dim, col_offs,
                          DROP_THRESHOLD, EPS)

    out3 = pl.pallas_call(
        kernel,
        out_shape=jax.ShapeDtypeStruct((n_steps, dim, group * l_), jnp.float32),
        grid_spec=pltpu.PrefetchScalarGridSpec(
            num_scalar_prefetch=0,
            grid=(n_steps,),
            in_specs=[
                pl.BlockSpec((1, dim, group * l_), lambda i: (i, 0, 0)),
                pl.BlockSpec(w_slab.shape, lambda i: (0, 0)),
                pl.BlockSpec(b_slab.shape, lambda i: (0, 0)),
            ],
            out_specs=pl.BlockSpec((1, dim, group * l_), lambda i: (i, 0, 0)),
        ),
        compiler_params=pltpu.CompilerParams(
            dimension_semantics=("parallel",)),
    )(x3, w_slab, b_slab)

    return (out3.reshape(n_steps, dim, group, l_)
                .transpose(0, 2, 1, 3)
                .reshape(b_, dim, l_))


# ------------------------- pure-JAX reference --------------------------------
def reference(x, params):
    (w_down, b_down, w_phi, b_phi, w_g, b_g,
     w_lg, b_lg, w_c1, b_c1, w_c2, b_c2, w_up, b_up) = params

    def conv(w, b, h):
        return jnp.einsum('oi,bil->bol', w, h) + b[None]

    xr = conv(w_down, b_down, x)
    residual = xr
    phi = conv(w_phi, b_phi, xr)
    g = conv(w_g, b_g, xr)
    Bn, Cn, Ln = xr.shape

    def shift(a, s):
        if s == 0:
            return a
        z = jnp.zeros((Bn, abs(s), Ln), a.dtype)
        if s > 0:
            return jnp.concatenate([a[:, s:, :], z], axis=1)
        return jnp.concatenate([z, a[:, :s, :]], axis=1)

    wins = [shift(g, w - LT // 2) for w in range(LT)]
    score = jnp.stack([jnp.sum(phi * gw, axis=-1) for gw in wins],
                      axis=-1) * (float(Cn) ** -0.5)
    p = jax.nn.softmax(score, axis=-1)                   # (B, C, LT)
    local_temp = sum(p[..., w][..., None] *
                     jnp.where(wins[w] < DROP_THRESHOLD, 0.0, wins[w])
                     for w in range(LT))

    local_global = conv(w_lg, b_lg, local_temp)

    def ln(a):
        mu = jnp.mean(a, axis=(1, 2), keepdims=True)
        var = jnp.mean((a - mu) ** 2, axis=(1, 2), keepdims=True)
        return (a - mu) / jnp.sqrt(var + EPS)

    ln1 = ln(local_global + residual)
    h = conv(w_c1, b_c1, ln1)
    h = h * jnp.tanh(jax.nn.softplus(h))
    h2 = conv(w_c2, b_c2, h)
    ln2 = ln(h2 + ln1)
    return conv(w_up, b_up, ln2)


if __name__ == "__main__":
    key = jax.random.PRNGKey(0)
    keys = jax.random.split(key, 16)

    def mk_w(k, o, i):
        return jax.random.normal(k, (o, i), jnp.float32) * 0.2

    def mk_b(k, o):
        return jax.random.normal(k, (o, 1), jnp.float32) * 0.1

    params = (
        mk_w(keys[0], C, BASE_FEAT_DIM), mk_b(keys[1], C),        # down
        mk_w(keys[2], C, C),             mk_b(keys[3], C),        # phi
        mk_w(keys[4], C, C),             mk_b(keys[5], C),        # g
        mk_w(keys[6], C, C),             mk_b(keys[7], C),        # lcoal_global
        mk_w(keys[8], HID, C),           mk_b(keys[9], HID),      # conv1
        mk_w(keys[10], C, HID),          mk_b(keys[11], C),       # conv2
        mk_w(keys[12], BASE_FEAT_DIM, C), mk_b(keys[13], BASE_FEAT_DIM),  # up
    )
    x = jax.random.normal(keys[14], (B, BASE_FEAT_DIM, L), jnp.float32)

    out = global_local_block(x, params)
    jax.block_until_ready(out)

    ref = reference(x, params)
    assert out.shape == (B, BASE_FEAT_DIM, L), out.shape
    # Tolerance covers the approximate (EUP) reciprocal in the softmax.
    assert jnp.allclose(out, ref, atol=5e-3, rtol=5e-3), \
        float(jnp.max(jnp.abs(out - ref)))
    print("KERNEL_OK")
</pallas_src>

<mosaic_0001>
module attributes {stable_mosaic.version = 11 : i64} {
  func.func @kernel(%arg0: i32, %arg1: memref<1x16x32xf32, #tpu.memory_space<vmem>>, %arg2: memref<32x80xf32, #tpu.memory_space<vmem>>, %arg3: memref<32x6xf32, #tpu.memory_space<vmem>>, %arg4: memref<1x16x32xf32, #tpu.memory_space<vmem>>) attributes {dimension_semantics = [#tpu.dimension_semantics<parallel>], iteration_bounds = array<i64: 1>, scalar_prefetch = 0 : i64, scratch_operands = 0 : i64, tpu.core_type = #tpu.core_type<tc>, window_params = [{transform_indices = @transform_0, window_bounds = array<i64: 1, 16, 32>}, {pipeline_mode = #tpu.pipeline_mode<synchronous>, transform_indices = @transform_1, window_bounds = array<i64: 32, 80>}, {pipeline_mode = #tpu.pipeline_mode<synchronous>, transform_indices = @transform_2, window_bounds = array<i64: 32, 6>}, {transform_indices = @transform_3, window_bounds = array<i64: 1, 16, 32>}]} {
    %c0 = arith.constant 0 : index
    %c0_0 = arith.constant 0 : index
    %0 = vector.load %arg2[%c0, %c0_0] : memref<32x80xf32, #tpu.memory_space<vmem>>, vector<32x80xf32>
    %c0_1 = arith.constant 0 : index
    %c0_2 = arith.constant 0 : index
    %1 = vector.load %arg3[%c0_1, %c0_2] : memref<32x6xf32, #tpu.memory_space<vmem>>, vector<32x6xf32>
    %2 = vector.extract_strided_slice %0 {offsets = [0, 0], sizes = [8, 16], strides = [1, 1]} : vector<32x80xf32> to vector<8x16xf32>
    %3 = vector.extract_strided_slice %0 {offsets = [0, 16], sizes = [16, 8], strides = [1, 1]} : vector<32x80xf32> to vector<16x8xf32>
    %4 = vector.extract_strided_slice %0 {offsets = [0, 24], sizes = [8, 8], strides = [1, 1]} : vector<32x80xf32> to vector<8x8xf32>
    %5 = vector.extract_strided_slice %0 {offsets = [0, 32], sizes = [32, 8], strides = [1, 1]} : vector<32x80xf32> to vector<32x8xf32>
    %6 = vector.extract_strided_slice %0 {offsets = [0, 40], sizes = [8, 32], strides = [1, 1]} : vector<32x80xf32> to vector<8x32xf32>
    %7 = vector.extract_strided_slice %0 {offsets = [0, 72], sizes = [16, 8], strides = [1, 1]} : vector<32x80xf32> to vector<16x8xf32>
    %8 = vector.extract_strided_slice %1 {offsets = [0, 0], sizes = [8, 1], strides = [1, 1]} : vector<32x6xf32> to vector<8x1xf32>
    %9 = vector.extract_strided_slice %1 {offsets = [0, 1], sizes = [16, 1], strides = [1, 1]} : vector<32x6xf32> to vector<16x1xf32>
    %10 = vector.extract_strided_slice %1 {offsets = [0, 2], sizes = [8, 1], strides = [1, 1]} : vector<32x6xf32> to vector<8x1xf32>
    %11 = vector.extract_strided_slice %1 {offsets = [0, 3], sizes = [32, 1], strides = [1, 1]} : vector<32x6xf32> to vector<32x1xf32>
    %12 = vector.extract_strided_slice %1 {offsets = [0, 4], sizes = [8, 1], strides = [1, 1]} : vector<32x6xf32> to vector<8x1xf32>
    %13 = vector.extract_strided_slice %1 {offsets = [0, 5], sizes = [16, 1], strides = [1, 1]} : vector<32x6xf32> to vector<16x1xf32>
    %c0_3 = arith.constant 0 : index
    %c0_4 = arith.constant 0 : index
    %c0_5 = arith.constant 0 : index
    %14 = vector.load %arg1[%c0_3, %c0_4, %c0_5] : memref<1x16x32xf32, #tpu.memory_space<vmem>>, vector<1x16x32xf32>
    %15 = vector.shape_cast %14 : vector<1x16x32xf32> to vector<16x32xf32>
    %cst = arith.constant dense<0.000000e+00> : vector<8x32xf32>
    %16 = tpu.matmul %2, %15, %cst {dimension_numbers = #tpu.dot_dimension_numbers<[1], [0], [0], [1], [0, 0, 1, 1], [], []>} : vector<8x16xf32>, vector<16x32xf32>, vector<8x32xf32> -> vector<8x32xf32>
    %17 = vector.broadcast %8 : vector<8x1xf32> to vector<8x32xf32>
    %18 = arith.addf %16, %17 : vector<8x32xf32>
    %cst_6 = arith.constant dense<0.000000e+00> : vector<16x32xf32>
    %19 = tpu.matmul %3, %18, %cst_6 {dimension_numbers = #tpu.dot_dimension_numbers<[1], [0], [0], [1], [0, 0, 1, 1], [], []>} : vector<16x8xf32>, vector<8x32xf32>, vector<16x32xf32> -> vector<16x32xf32>
    %20 = vector.broadcast %9 : vector<16x1xf32> to vector<16x32xf32>
    %21 = arith.addf %19, %20 : vector<16x32xf32>
    %22 = vector.extract_strided_slice %21 {offsets = [0, 0], sizes = [8, 32], strides = [1, 1]} : vector<16x32xf32> to vector<8x32xf32>
    %23 = vector.extract_strided_slice %21 {offsets = [8, 0], sizes = [8, 32], strides = [1, 1]} : vector<16x32xf32> to vector<8x32xf32>
    %cst_7 = arith.constant 5.000000e-02 : f32
    %24 = vector.broadcast %cst_7 : f32 to vector<8x32xf32>
    %25 = arith.cmpf olt, %23, %24 : vector<8x32xf32>
    %cst_8 = arith.constant 0.000000e+00 : f32
    %26 = vector.broadcast %cst_8 : f32 to vector<8x32xf32>
    %27 = arith.select %25, %26, %23 : vector<8x32xi1>, vector<8x32xf32>
    %28 = tpu.iota {dimensions = array<i32: 0>} : vector<8x8xi32>
    %29 = tpu.iota {dimensions = array<i32: 1>} : vector<8x8xi32>
    %30 = arith.subi %29, %28 : vector<8x8xi32>
    %c2_i32 = arith.constant 2 : i32
    %31 = vector.broadcast %c2_i32 : i32 to vector<8x8xi32>
    %32 = arith.addi %30, %31 : vector<8x8xi32>
    %c0_i32 = arith.constant 0 : i32
    %33 = vector.broadcast %c0_i32 : i32 to vector<8x8xi32>
    %34 = arith.cmpi sge, %32, %33 : vector<8x8xi32>
    %c4_i32 = arith.constant 4 : i32
    %35 = vector.broadcast %c4_i32 : i32 to vector<8x8xi32>
    %36 = arith.cmpi slt, %32, %35 : vector<8x8xi32>
    %37 = arith.andi %34, %36 : vector<8x8xi1>
    %38 = arith.extui %37 : vector<8x8xi1> to vector<8x8xi32>
    %39 = arith.sitofp %38 : vector<8x8xi32> to vector<8x8xf32>
    %cst_9 = arith.constant dense<0.000000e+00> : vector<8xf32>
    %40 = vector.multi_reduction <add>, %39, %cst_9 [1] : vector<8x8xf32> to vector<8xf32>
    %41 = vector.shape_cast %40 : vector<8xf32> to vector<8x1xf32>
    %cst_10 = arith.constant 4.000000e+00 : f32
    %42 = vector.broadcast %cst_10 : f32 to vector<8x1xf32>
    %43 = arith.subf %42, %41 : vector<8x1xf32>
    %cst_11 = arith.constant 0.000000e+00 : f32
    %44 = vector.broadcast %cst_11 : f32 to vector<8x1xf32>
    %45 = arith.cmpf ogt, %43, %44 : vector<8x1xf32>
    %46 = vector.extract_strided_slice %22 {offsets = [0, 0], sizes = [8, 16], strides = [1, 1]} : vector<8x32xf32> to vector<8x16xf32>
    %47 = vector.extract_strided_slice %23 {offsets = [0, 0], sizes = [8, 16], strides = [1, 1]} : vector<8x32xf32> to vector<8x16xf32>
    %cst_12 = arith.constant dense<0.000000e+00> : vector<8x8xf32>
    %48 = tpu.matmul %46, %47, %cst_12 {dimension_numbers = #tpu.dot_dimension_numbers<[1], [1], [0], [0], [0, 0, 1, 0], [], []>} : vector<8x16xf32>, vector<8x16xf32>, vector<8x8xf32> -> vector<8x8xf32>
    %cst_13 = arith.constant 0.353553385 : f32
    %49 = vector.broadcast %cst_13 : f32 to vector<8x8xf32>
    %50 = arith.mulf %48, %49 : vector<8x8xf32>
    %cst_14 = arith.constant -1.000000e+30 : f32
    %51 = vector.broadcast %cst_14 : f32 to vector<8x8xf32>
    %52 = arith.select %37, %50, %51 : vector<8x8xi1>, vector<8x8xf32>
    %cst_15 = arith.constant dense<0xFF800000> : vector<8xf32>
    %53 = vector.multi_reduction <maximumf>, %52, %cst_15 [1] : vector<8x8xf32> to vector<8xf32>
    %54 = vector.shape_cast %53 : vector<8xf32> to vector<8x1xf32>
    %cst_16 = arith.constant 0.000000e+00 : f32
    %55 = vector.broadcast %cst_16 : f32 to vector<8x1xf32>
    %56 = arith.maximumf %54, %55 : vector<8x1xf32>
    %57 = arith.select %45, %56, %54 : vector<8x1xi1>, vector<8x1xf32>
    %58 = vector.broadcast %57 : vector<8x1xf32> to vector<8x8xf32>
    %59 = arith.subf %52, %58 : vector<8x8xf32>
    %60 = math.exp %59 : vector<8x8xf32>
    %cst_17 = arith.constant dense<0.000000e+00> : vector<8xf32>
    %61 = vector.multi_reduction <add>, %60, %cst_17 [1] : vector<8x8xf32> to vector<8xf32>
    %62 = vector.shape_cast %61 : vector<8xf32> to vector<8x1xf32>
    %cst_18 = arith.constant 0.000000e+00 : f32
    %63 = vector.broadcast %cst_18 : f32 to vector<8x1xf32>
    %64 = arith.maximumf %57, %63 : vector<8x1xf32>
    %cst_19 = arith.constant 0.000000e+00 : f32
    %65 = vector.broadcast %cst_19 : f32 to vector<8x1xf32>
    %66 = arith.subf %65, %64 : vector<8x1xf32>
    %67 = math.exp %66 : vector<8x1xf32>
    %68 = arith.mulf %43, %67 : vector<8x1xf32>
    %69 = arith.addf %62, %68 : vector<8x1xf32>
    %70 = tpu.reciprocal %69 {approx = true} : vector<8x1xf32> -> vector<8x1xf32>
    %71 = vector.broadcast %70 : vector<8x1xf32> to vector<8x8xf32>
    %72 = arith.mulf %60, %71 : vector<8x8xf32>
    %73 = vector.extract_strided_slice %27 {offsets = [0, 0], sizes = [8, 16], strides = [1, 1]} : vector<8x32xf32> to vector<8x16xf32>
    %cst_20 = arith.constant dense<0.000000e+00> : vector<8x16xf32>
    %74 = tpu.matmul %72, %73, %cst_20 {dimension_numbers = #tpu.dot_dimension_numbers<[1], [0], [0], [1], [0, 0, 1, 1], [], []>} : vector<8x8xf32>, vector<8x16xf32>, vector<8x16xf32> -> vector<8x16xf32>
    %75 = vector.extract_strided_slice %22 {offsets = [0, 16], sizes = [8, 16], strides = [1, 1]} : vector<8x32xf32> to vector<8x16xf32>
    %76 = vector.extract_strided_slice %23 {offsets = [0, 16], sizes = [8, 16], strides = [1, 1]} : vector<8x32xf32> to vector<8x16xf32>
    %cst_21 = arith.constant dense<0.000000e+00> : vector<8x8xf32>
    %77 = tpu.matmul %75, %76, %cst_21 {dimension_numbers = #tpu.dot_dimension_numbers<[1], [1], [0], [0], [0, 0, 1, 0], [], []>} : vector<8x16xf32>, vector<8x16xf32>, vector<8x8xf32> -> vector<8x8xf32>
    %cst_22 = arith.constant 0.353553385 : f32
    %78 = vector.broadcast %cst_22 : f32 to vector<8x8xf32>
    %79 = arith.mulf %77, %78 : vector<8x8xf32>
    %cst_23 = arith.constant -1.000000e+30 : f32
    %80 = vector.broadcast %cst_23 : f32 to vector<8x8xf32>
    %81 = arith.select %37, %79, %80 : vector<8x8xi1>, vector<8x8xf32>
    %cst_24 = arith.constant dense<0xFF800000> : vector<8xf32>
    %82 = vector.multi_reduction <maximumf>, %81, %cst_24 [1] : vector<8x8xf32> to vector<8xf32>
    %83 = vector.shape_cast %82 : vector<8xf32> to vector<8x1xf32>
    %cst_25 = arith.constant 0.000000e+00 : f32
    %84 = vector.broadcast %cst_25 : f32 to vector<8x1xf32>
    %85 = arith.maximumf %83, %84 : vector<8x1xf32>
    %86 = arith.select %45, %85, %83 : vector<8x1xi1>, vector<8x1xf32>
    %87 = vector.broadcast %86 : vector<8x1xf32> to vector<8x8xf32>
    %88 = arith.subf %81, %87 : vector<8x8xf32>
    %89 = math.exp %88 : vector<8x8xf32>
    %cst_26 = arith.constant dense<0.000000e+00> : vector<8xf32>
    %90 = vector.multi_reduction <add>, %89, %cst_26 [1] : vector<8x8xf32> to vector<8xf32>
    %91 = vector.shape_cast %90 : vector<8xf32> to vector<8x1xf32>
    %cst_27 = arith.constant 0.000000e+00 : f32
    %92 = vector.broadcast %cst_27 : f32 to vector<8x1xf32>
    %93 = arith.maximumf %86, %92 : vector<8x1xf32>
    %cst_28 = arith.constant 0.000000e+00 : f32
    %94 = vector.broadcast %cst_28 : f32 to vector<8x1xf32>
    %95 = arith.subf %94, %93 : vector<8x1xf32>
    %96 = math.exp %95 : vector<8x1xf32>
    %97 = arith.mulf %43, %96 : vector<8x1xf32>
    %98 = arith.addf %91, %97 : vector<8x1xf32>
    %99 = tpu.reciprocal %98 {approx = true} : vector<8x1xf32> -> vector<8x1xf32>
    %100 = vector.broadcast %99 : vector<8x1xf32> to vector<8x8xf32>
    %101 = arith.mulf %89, %100 : vector<8x8xf32>
    %102 = vector.extract_strided_slice %27 {offsets = [0, 16], sizes = [8, 16], strides = [1, 1]} : vector<8x32xf32> to vector<8x16xf32>
    %cst_29 = arith.constant dense<0.000000e+00> : vector<8x16xf32>
    %103 = tpu.matmul %101, %102, %cst_29 {dimension_numbers = #tpu.dot_dimension_numbers<[1], [0], [0], [1], [0, 0, 1, 1], [], []>} : vector<8x8xf32>, vector<8x16xf32>, vector<8x16xf32> -> vector<8x16xf32>
    %104 = tpu.concatenate %74, %103 in 1 : vector<8x16xf32>, vector<8x16xf32> -> vector<8x32xf32>
    %cst_30 = arith.constant dense<0.000000e+00> : vector<8x32xf32>
    %105 = tpu.matmul %4, %104, %cst_30 {dimension_numbers = #tpu.dot_dimension_numbers<[1], [0], [0], [1], [0, 0, 1, 1], [], []>} : vector<8x8xf32>, vector<8x32xf32>, vector<8x32xf32> -> vector<8x32xf32>
    %106 = vector.broadcast %10 : vector<8x1xf32> to vector<8x32xf32>
    %107 = arith.addf %105, %106 : vector<8x32xf32>
    %108 = arith.addf %107, %18 : vector<8x32xf32>
    %109 = vector.extract_strided_slice %108 {offsets = [0, 0], sizes = [8, 16], strides = [1, 1]} : vector<8x32xf32> to vector<8x16xf32>
    %110 = vector.shape_cast %109 : vector<8x16xf32> to vector<1x8x16xf32>
    %cst_31 = arith.constant dense<0.000000e+00> : vector<1xf32>
    %111 = vector.multi_reduction <add>, %110, %cst_31 [1, 2] : vector<1x8x16xf32> to vector<1xf32>
    %112 = vector.shape_cast %111 : vector<1xf32> to vector<1x1x1xf32>
    %113 = vector.extract %112[0, 0, 0] : f32 from vector<1x1x1xf32>
    %114 = arith.mulf %109, %109 : vector<8x16xf32>
    %115 = vector.shape_cast %114 : vector<8x16xf32> to vector<1x8x16xf32>
    %cst_32 = arith.constant dense<0.000000e+00> : vector<1xf32>
    %116 = vector.multi_reduction <add>, %115, %cst_32 [1, 2] : vector<1x8x16xf32> to vector<1xf32>
    %117 = vector.shape_cast %116 : vector<1xf32> to vector<1x1x1xf32>
    %118 = vector.extract %117[0, 0, 0] : f32 from vector<1x1x1xf32>
    %cst_33 = arith.constant 7.812500e-03 : f32
    %119 = arith.mulf %113, %cst_33 : f32
    %cst_34 = arith.constant 7.812500e-03 : f32
    %120 = arith.mulf %118, %cst_34 : f32
    %121 = arith.mulf %119, %119 : f32
    %122 = arith.subf %120, %121 : f32
    %cst_35 = arith.constant 0.000000e+00 : f32
    %123 = arith.maximumf %122, %cst_35 : f32
    %124 = vector.broadcast %119 : f32 to vector<8x16xf32>
    %125 = arith.subf %109, %124 : vector<8x16xf32>
    %cst_36 = arith.constant 9.99999974E-6 : f32
    %126 = arith.addf %123, %cst_36 : f32
    %127 = math.rsqrt %126 : f32
    %128 = vector.broadcast %127 : f32 to vector<8x16xf32>
    %129 = arith.mulf %125, %128 : vector<8x16xf32>
    %130 = vector.extract_strided_slice %108 {offsets = [0, 16], sizes = [8, 16], strides = [1, 1]} : vector<8x32xf32> to vector<8x16xf32>
    %131 = vector.shape_cast %130 : vector<8x16xf32> to vector<1x8x16xf32>
    %cst_37 = arith.constant dense<0.000000e+00> : vector<1xf32>
    %132 = vector.multi_reduction <add>, %131, %cst_37 [1, 2] : vector<1x8x16xf32> to vector<1xf32>
    %133 = vector.shape_cast %132 : vector<1xf32> to vector<1x1x1xf32>
    %134 = vector.extract %133[0, 0, 0] : f32 from vector<1x1x1xf32>
    %135 = arith.mulf %130, %130 : vector<8x16xf32>
    %136 = vector.shape_cast %135 : vector<8x16xf32> to vector<1x8x16xf32>
    %cst_38 = arith.constant dense<0.000000e+00> : vector<1xf32>
    %137 = vector.multi_reduction <add>, %136, %cst_38 [1, 2] : vector<1x8x16xf32> to vector<1xf32>
    %138 = vector.shape_cast %137 : vector<1xf32> to vector<1x1x1xf32>
    %139 = vector.extract %138[0, 0, 0] : f32 from vector<1x1x1xf32>
    %cst_39 = arith.constant 7.812500e-03 : f32
    %140 = arith.mulf %134, %cst_39 : f32
    %cst_40 = arith.constant 7.812500e-03 : f32
    %141 = arith.mulf %139, %cst_40 : f32
    %142 = arith.mulf %140, %140 : f32
    %143 = arith.subf %141, %142 : f32
    %cst_41 = arith.constant 0.000000e+00 : f32
    %144 = arith.maximumf %143, %cst_41 : f32
    %145 = vector.broadcast %140 : f32 to vector<8x16xf32>
    %146 = arith.subf %130, %145 : vector<8x16xf32>
    %cst_42 = arith.constant 9.99999974E-6 : f32
    %147 = arith.addf %144, %cst_42 : f32
    %148 = math.rsqrt %147 : f32
    %149 = vector.broadcast %148 : f32 to vector<8x16xf32>
    %150 = arith.mulf %146, %149 : vector<8x16xf32>
    %151 = tpu.concatenate %129, %150 in 1 : vector<8x16xf32>, vector<8x16xf32> -> vector<8x32xf32>
    %cst_43 = arith.constant dense<0.000000e+00> : vector<32x32xf32>
    %152 = tpu.matmul %5, %151, %cst_43 {dimension_numbers = #tpu.dot_dimension_numbers<[1], [0], [0], [1], [0, 0, 1, 1], [], []>} : vector<32x8xf32>, vector<8x32xf32>, vector<32x32xf32> -> vector<32x32xf32>
    %153 = vector.broadcast %11 : vector<32x1xf32> to vector<32x32xf32>
    %154 = arith.addf %152, %153 : vector<32x32xf32>
    %cst_44 = arith.constant 0.000000e+00 : f32
    %155 = vector.broadcast %cst_44 : f32 to vector<32x32xf32>
    %156 = arith.maximumf %154, %155 : vector<32x32xf32>
    %157 = math.absf %154 : vector<32x32xf32>
    %cst_45 = arith.constant 0.000000e+00 : f32
    %158 = vector.broadcast %cst_45 : f32 to vector<32x32xf32>
    %159 = arith.subf %158, %157 : vector<32x32xf32>
    %160 = math.exp %159 : vector<32x32xf32>
    %161 = math.log1p %160 : vector<32x32xf32>
    %162 = arith.addf %156, %161 : vector<32x32xf32>
    %163 = math.tanh %162 : vector<32x32xf32>
    %164 = arith.mulf %154, %163 : vector<32x32xf32>
    %cst_46 = arith.constant dense<0.000000e+00> : vector<8x32xf32>
    %165 = tpu.matmul %6, %164, %cst_46 {dimension_numbers = #tpu.dot_dimension_numbers<[1], [0], [0], [1], [0, 0, 1, 1], [], []>} : vector<8x32xf32>, vector<32x32xf32>, vector<8x32xf32> -> vector<8x32xf32>
    %166 = vector.broadcast %12 : vector<8x1xf32> to vector<8x32xf32>
    %167 = arith.addf %165, %166 : vector<8x32xf32>
    %168 = arith.addf %167, %151 : vector<8x32xf32>
    %169 = vector.extract_strided_slice %168 {offsets = [0, 0], sizes = [8, 16], strides = [1, 1]} : vector<8x32xf32> to vector<8x16xf32>
    %170 = vector.shape_cast %169 : vector<8x16xf32> to vector<1x8x16xf32>
    %cst_47 = arith.constant dense<0.000000e+00> : vector<1xf32>
    %171 = vector.multi_reduction <add>, %170, %cst_47 [1, 2] : vector<1x8x16xf32> to vector<1xf32>
    %172 = vector.shape_cast %171 : vector<1xf32> to vector<1x1x1xf32>
    %173 = vector.extract %172[0, 0, 0] : f32 from vector<1x1x1xf32>
    %174 = arith.mulf %169, %169 : vector<8x16xf32>
    %175 = vector.shape_cast %174 : vector<8x16xf32> to vector<1x8x16xf32>
    %cst_48 = arith.constant dense<0.000000e+00> : vector<1xf32>
    %176 = vector.multi_reduction <add>, %175, %cst_48 [1, 2] : vector<1x8x16xf32> to vector<1xf32>
    %177 = vector.shape_cast %176 : vector<1xf32> to vector<1x1x1xf32>
    %178 = vector.extract %177[0, 0, 0] : f32 from vector<1x1x1xf32>
    %cst_49 = arith.constant 7.812500e-03 : f32
    %179 = arith.mulf %173, %cst_49 : f32
    %cst_50 = arith.constant 7.812500e-03 : f32
    %180 = arith.mulf %178, %cst_50 : f32
    %181 = arith.mulf %179, %179 : f32
    %182 = arith.subf %180, %181 : f32
    %cst_51 = arith.constant 0.000000e+00 : f32
    %183 = arith.maximumf %182, %cst_51 : f32
    %184 = vector.broadcast %179 : f32 to vector<8x16xf32>
    %185 = arith.subf %169, %184 : vector<8x16xf32>
    %cst_52 = arith.constant 9.99999974E-6 : f32
    %186 = arith.addf %183, %cst_52 : f32
    %187 = math.rsqrt %186 : f32
    %188 = vector.broadcast %187 : f32 to vector<8x16xf32>
    %189 = arith.mulf %185, %188 : vector<8x16xf32>
    %190 = vector.extract_strided_slice %168 {offsets = [0, 16], sizes = [8, 16], strides = [1, 1]} : vector<8x32xf32> to vector<8x16xf32>
    %191 = vector.shape_cast %190 : vector<8x16xf32> to vector<1x8x16xf32>
    %cst_53 = arith.constant dense<0.000000e+00> : vector<1xf32>
    %192 = vector.multi_reduction <add>, %191, %cst_53 [1, 2] : vector<1x8x16xf32> to vector<1xf32>
    %193 = vector.shape_cast %192 : vector<1xf32> to vector<1x1x1xf32>
    %194 = vector.extract %193[0, 0, 0] : f32 from vector<1x1x1xf32>
    %195 = arith.mulf %190, %190 : vector<8x16xf32>
    %196 = vector.shape_cast %195 : vector<8x16xf32> to vector<1x8x16xf32>
    %cst_54 = arith.constant dense<0.000000e+00> : vector<1xf32>
    %197 = vector.multi_reduction <add>, %196, %cst_54 [1, 2] : vector<1x8x16xf32> to vector<1xf32>
    %198 = vector.shape_cast %197 : vector<1xf32> to vector<1x1x1xf32>
    %199 = vector.extract %198[0, 0, 0] : f32 from vector<1x1x1xf32>
    %cst_55 = arith.constant 7.812500e-03 : f32
    %200 = arith.mulf %194, %cst_55 : f32
    %cst_56 = arith.constant 7.812500e-03 : f32
    %201 = arith.mulf %199, %cst_56 : f32
    %202 = arith.mulf %200, %200 : f32
    %203 = arith.subf %201, %202 : f32
    %cst_57 = arith.constant 0.000000e+00 : f32
    %204 = arith.maximumf %203, %cst_57 : f32
    %205 = vector.broadcast %200 : f32 to vector<8x16xf32>
    %206 = arith.subf %190, %205 : vector<8x16xf32>
    %cst_58 = arith.constant 9.99999974E-6 : f32
    %207 = arith.addf %204, %cst_58 : f32
    %208 = math.rsqrt %207 : f32
    %209 = vector.broadcast %208 : f32 to vector<8x16xf32>
    %210 = arith.mulf %206, %209 : vector<8x16xf32>
    %211 = tpu.concatenate %189, %210 in 1 : vector<8x16xf32>, vector<8x16xf32> -> vector<8x32xf32>
    %cst_59 = arith.constant dense<0.000000e+00> : vector<16x32xf32>
    %212 = tpu.matmul %7, %211, %cst_59 {dimension_numbers = #tpu.dot_dimension_numbers<[1], [0], [0], [1], [0, 0, 1, 1], [], []>} : vector<16x8xf32>, vector<8x32xf32>, vector<16x32xf32> -> vector<16x32xf32>
    %213 = vector.broadcast %13 : vector<16x1xf32> to vector<16x32xf32>
    %214 = arith.addf %212, %213 : vector<16x32xf32>
    %c0_60 = arith.constant 0 : index
    %c0_61 = arith.constant 0 : index
    %c0_62 = arith.constant 0 : index
    %215 = vector.load %arg4[%c0_60, %c0_61, %c0_62] : memref<1x16x32xf32, #tpu.memory_space<vmem>>, vector<1x16x32xf32>
    %216 = vector.shape_cast %215 : vector<1x16x32xf32> to vector<16x32xf32>
    %217 = vector.shape_cast %214 : vector<16x32xf32> to vector<1x16x32xf32>
    tpu.vector_store %arg4[%c0_60, %c0_61, %c0_62], %217 {strides = array<i32>} : memref<1x16x32xf32, #tpu.memory_space<vmem>>, vector<1x16x32xf32>,
    return
  }
  func.func @transform_0(%arg0: i32) -> (i32, i32, i32) {
    %c0_i32 = arith.constant 0 : i32
    %c0_i32_0 = arith.constant 0 : i32
    %c0_i32_1 = arith.constant 0 : i32
    return %arg0, %c0_i32, %c0_i32_0 : i32, i32, i32
  }
  func.func @transform_1(%arg0: i32) -> (i32, i32) {
    %c0_i32 = arith.constant 0 : i32
    %c0_i32_0 = arith.constant 0 : i32
    %c0_i32_1 = arith.constant 0 : i32
    return %c0_i32, %c0_i32_0 : i32, i32
  }
  func.func @transform_2(%arg0: i32) -> (i32, i32) {
    %c0_i32 = arith.constant 0 : i32
    %c0_i32_0 = arith.constant 0 : i32
    %c0_i32_1 = arith.constant 0 : i32
    return %c0_i32, %c0_i32_0 : i32, i32
  }
  func.func @transform_3(%arg0: i32) -> (i32, i32, i32) {
    %c0_i32 = arith.constant 0 : i32
    %c0_i32_0 = arith.constant 0 : i32
    %c0_i32_1 = arith.constant 0 : i32
    return %arg0, %c0_i32, %c0_i32_0 : i32, i32, i32
  }
}

</mosaic_0001>

<bundles_post_ra>
// kernel: tpu_custom_call.1
= control target key start
LH: loop header
LB: loop body
LE: loop exit
PB: predicated region body
PF: predicated region fallthrough
CT: control target
= control target key end

     0   :  { %8 = vsyncpa [#allocation3], 0  ;;  %s1712_s0 = inlined_call_operand.hbm [shape: f32[1,16,32], index: 0, kind: input, shape index: {}]   ;;  %s1713_s1 = inlined_call_operand.vmem [shape: f32[32,80], index: 1, kind: input, shape index: {}]   ;;  %s1714_s2 = inlined_call_operand.vmem [shape: f32[32,6], index: 2, kind: input, shape index: {}]   ;;  %s1715_s3 = inlined_call_operand.hbm [shape: f32[1,16,32], index: 3, kind: output, shape index: {}]  }
   0x1   :  { %9 = vsyncpa [#allocation4], 0  ;;  %s1455_s12 = smov [#allocation2]   ;;  %s1407_s16 = scalar_lea.hbm %s1712_s0, 256 }
   0x2   :  { %s15_s13 = sshll.u32 %s1455_s12, 4  ;;  %p1408_p0 = scmp.ne.s32.totalorder %s1712_s0, %s1407_s16  ;;  %s16_s13 = int_to_ptr.vmem [resolvable:$true] %s15_s13 }
   0x3   :  { %p1411_p1 = scmp.lt.u32.totalorder %s1407_s16, %s1712_s0 }
   0x5   :  { %p1413_p2 = pnand %p1411_p1, %p1408_p0 }
   0x7   :  { %1416 = shalt.err (!%p1413_p2)
}
   0x8   :  { %s1417_s21 = scalar_lea.vmem %s16_s13, 256  ;;  %p1422_p4 = scmp.lt.s32.totalorder %s16_s13, %s16_s13 }
   0x9   :  { %p1418_p3 = scmp.ne.s32.totalorder %s16_s13, %s1417_s21  ;;  %p1423_p5 = scmp.lt.s32.totalorder %s1417_s21, %s1417_s21 }
   0xb   :  { %p1424_p6 = por %p1423_p5, %p1422_p4 }
   0xd   :  { %p1425_p7 = pnand %p1424_p6, %p1418_p3 }
   0xf   :  { %1428 = shalt.err (!%p1425_p7)
}
  0x10   :  { %s1456_s22 = smov 128   ;;  %s1457_s23 = smov 8  }
  0x11   :  { %21 = dma.hbm_to_vmem [thread:$0]  %s1712_s0, 256, %s16_s13, [#allocation3], %s1456_s22, %s1456_s22, %s1457_s23  }
  0x12   :  { %1451 = dma.done.wait [#allocation3], 256  }
  0x13   :  { %1452 = vsyncadd [#allocation3], 4294967040  ;;  %v1458_v0 = vmov 0.0|0.0   ;;  %vm1459_vm0 = vmmov 0   ;;  %v1460_v1 = vmov 0.0   ;;  %v1461_v2 = vmov 0  }
  0x14   :  { %1301 = vmatprep.subr.bf16.mxu0 %v1458_v0  ;;  %1244 = vmatprep.mubr.msk.f32.mxu0 %vm1459_vm0, %v1460_v1  ;;  %v37_v3 = vld [vmem:[#allocation2] sm:$0xff]  ;;  %v38_v4 = vld [vmem:[#allocation2 + $0x8] sm:$0xff]  ;;  %s1462_s29 = smov 112   ;;  %vm44_vm1 = vcmask 130048   ;;  %v1463_v10 = vmov 1   ;;  %vm132_vm2 = vcmask 64512   ;;  %v214_v24 = vlaneseq }
  0x15   :  { %1354 = vset.pattern.permute.xlu0 %v1461_v2  ;;  %v1302_v5 = vpack.c.bf16 %v38_v4, %v37_v3  ;;  %v1516_v6 = vld [vmem:[%s1714_s2] sm:$0xff]  ;;  %v1521_v7 = vld [vmem:[%s1713_s1 + $0x8] sm:$0xff]  ;;  %1355 = vset.pattern.permute.xlu1 %v1463_v10  ;;  %s1465_s7 = smov 16   ;;  %s1466_s8 = smov 104   ;;  %vm931_vm13 = vcmask 261120  }
  0x16   :  { %41 = vperm.xlu0 %1354, %v1516_v6   ;;  %130 = vrot.lane.b32.xlu1 %v1521_v7, %s1462_s29  ;;  %v1529_v8 = vld [vmem:[%s1713_s1] sm:$0xff]  ;;  %v1541_v9 = vld [vmem:[%s1714_s2 + $0x8] sm:$0xff]  ;;  %v215_v25 = vshrl.u32 %v214_v24, 7  ;;  %v217_v26 = vand.u32 127, %v214_v24  ;;  %v1464_v24 = vmov 2   ;;  %s1467_s9 = smov 96  }
  0x17   :  { %1303 = vmatpush3.bf16.msra.mxu0 %v1302_v5  ;;  %s1468_s20 = smov 0.0   ;;  %s1470_s0 = smov 88  }
  0x18   :  { %1257 = vmatprep.subr.mxu0 %v1460_v1  ;;  %v218_v27 = vsub.s32 %v217_v26, %v215_v25 }
  0x1a   :  { %1245 = vmatmul.mubr.msk.f32.vlgmr.msra.gmra.mrb[0].mxu0 %vm44_vm1, %v1529_v8  ;;  %128 = vrot.lane.b32.xlu0 %v1529_v8, %s1462_s29  ;;  %v219_v28 = vadd.s32 2, %v218_v27 }
  0x1b   :  { %1259 = vmatprep.mubr.msk.f32.mxu0 %vm1459_vm0, %v1460_v1  ;;  %1356 = vset.pattern.permute.xlu0 %v1463_v10 }
  0x1c   :  { %124 = vperm.xlu1 %1355, %v1541_v9   ;;  %vm220_vm5 = vcmp.ge.s32.totalorder %v219_v28, 0  ;;  %vm221_vm6 = vcmp.lt.s32.totalorder %v219_v28, 4 }
  0x1d   :  { %vm1562_vm7 = vmand %vm220_vm5, %vm221_vm6 }
  0x1e   :  { %119 = vperm.xlu0 %1356, %v1516_v6   ;;  %v1194_v30 = vsel %vm1562_vm7, 1.0, %v1460_v1 }
  0x1f   :  { %v225_v31 = vsel %vm132_vm2, %v1194_v30, 0.0 }
  0x22   :  { %1357 = vset.pattern.permute.xlu0 %v1464_v24 }
  0x3d   :  { %226 = vadd.xlane.f32.xlu0 %v225_v31 }
  0x88   :  { %v131_v16 = vpop.permute.xlu1 %130 }
  0x95   :  { %v42_v11 = vpop.permute.xlu0 %41 }
  0x99   :  { %v129_v12 = vpop.permute.xlu0 %128 }
  0x9a   :  { %1249 = vmatprep.mubr.msk.f32.mxu1 %vm132_vm2, %v129_v12 }
  0x9b   :  { %v125_v17 = vpop.permute.xlu1 %124 }
  0x9d   :  { %v120_v20 = vpop.permute.xlu0 %119 }
  0xca   :  { %v227_v44 = vpop.xlane.xlu0 %226 }
  0xcb   :  { %v228_v45 = vsub.f32 4.0, %v227_v44 }
  0xcd   :  { %vm229_vm8 = vcmp.gt.f32.partialorder %v228_v45, 0.0 }
  0xed   :  { %v114_v13 = vpop.f32.mrb[0].mxu0 }
  0xee   :  { %v1546_v14 = vadd.f32 %v114_v13, %v42_v11  ;;  %v1246_v15 = vpop.f32.mrb[1].mxu0 }
  0xf0   :  { %1247 = vmatprep.subr.mxu1 %v1546_v14 }
  0xf1   :  { %1248 = vmatpush3.msra.mxu1 %v1546_v14 }
  0xf2   :  { %1250 = vmatmul.mubr.msk.f32.vlgmr.msra.gmra.mrb[0].mxu1 %vm132_vm2, %v131_v16  ;;  %1252 = vmatprep.subr.mxu1 %v1460_v1 }
  0xf3   :  { %1254 = vmatprep.mubr.msk.f32.mxu1 %vm1459_vm0, %v1460_v1 }
 0x1c5   :  { %v1251_v18 = vpop.f32.mrb[0].mxu1 }
 0x1c6   :  { %v209_v19 = vadd.f32 %v1251_v18, %v125_v17  ;;  %v203_v21 = vpop.f32.mrb[1].mxu1 }
 0x1c7   :  { %v204_v22 = vadd.f32 %v203_v21, %v120_v20 }
 0x1c8   :  { %402 = vrot.lane.b32.xlu1 %v209_v19, %s1462_s29  ;;  %1253 = vmatpush3.xpose.msk.msra.mxu1 %vm44_vm1, %v209_v19  ;;  %vm212_vm3 = vcmp.lt.f32.partialorder %v209_v19, 0.05 }
 0x1c9   :  { %vm1197_vm4 = vmneg %vm212_vm3  ;;  %1262 = vmatprep.subr.mxu1 %v1460_v1  ;;  %v213_v23 = vsel %vm212_vm3, 0.0, %v209_v19 }
 0x1ca   :  { %1258 = vmatpush3.msk.msra.mxu0 %vm1197_vm4, %v209_v19 }
 0x1cb   :  { %1255 = vmatmul.mubr.msk.f32.vlgmr.msra.gmra.mrb[2].mxu1 %vm44_vm1, %v204_v22  ;;  %1267 = vmatprep.subr.mxu0 %v1460_v1 }
 0x1cc   :  { %400 = vrot.lane.b32.xlu1 %v204_v22, %s1462_s29  ;;  %1264 = vmatprep.mubr.msk.f32.mxu1 %vm1459_vm0, %v1460_v1 }
 0x23a   :  { %v403_v32 = vpop.permute.xlu1 %402 }
 0x23b   :  { %1263 = vmatpush3.xpose.msk.msra.mxu1 %vm44_vm1, %v403_v32 }
 0x23c   :  { %1272 = vmatprep.subr.mxu1 %v1460_v1 }
 0x23e   :  { %v401_v33 = vpop.permute.xlu1 %400 }
 0x23f   :  { %1265 = vmatmul.mubr.msk.f32.vlgmr.msra.gmra.mrb[4].mxu1 %vm44_vm1, %v401_v33 }
 0x240   :  { %1274 = vmatprep.mubr.msk.f32.mxu1 %vm1459_vm0, %v1460_v1 }
 0x29e   :  { %v302_v34 = vpop.f32.mrb[2].mxu1 }
 0x29f   :  { %v306_v35 = vmul.f32 0.35355338, %v302_v34  ;;  %v1256_v36 = vpop.f32.mrb[3].mxu1 }
 0x2a1   :  { %v307_v37 = vsel %vm1562_vm7, %v306_v35, -1e+30 }
 0x2a2   :  { %v308_v38 = vsel %vm132_vm2, %v307_v37, -inf }
 0x2a3   :  { %309 = vmax.xlane.f32.xlu1 %v308_v38 }
 0x312   :  { %v474_v39 = vpop.f32.mrb[4].mxu1 }
 0x313   :  { %v478_v40 = vmul.f32 0.35355338, %v474_v39  ;;  %v1266_v41 = vpop.f32.mrb[5].mxu1 }
 0x315   :  { %v479_v42 = vsel %vm1562_vm7, %v478_v40, -1e+30 }
 0x316   :  { %v480_v43 = vsel %vm132_vm2, %v479_v42, -inf }
 0x317   :  { %481 = vmax.xlane.f32.xlu0 %v480_v43 }
 0x330   :  { %v310_v46 = vpop.xlane.xlu1 %309 }
 0x331   :  { %v311_v47 = vmax.f32 %v310_v46, 0.0 }
 0x333   :  { %v312_v48 = vsel %vm229_vm8, %v311_v47, %v310_v46 }
 0x334   :  { %v313_v49 = vsub.f32 %v307_v37, %v312_v48  ;;  %v319_v59 = vmax.f32 %v312_v48, 0.0 }
 0x336   :  { %v314_v50 = vmul.f32 1.442695, %v313_v49  ;;  %v320_v61 = vsub.f32 0.0, %v319_v59 }
 0x338   :  { %1363 = vpow2.f32 %v314_v50  ;;  %v321_v62 = vmul.f32 1.442695, %v320_v61 }
 0x342   :  { %v1364_v51 = vpop.eup %1363 }
 0x343   :  { %v316_v52 = vsel %vm132_vm2, %v1364_v51, 0.0 }
 0x344   :  { %317 = vadd.xlane.f32.xlu0 %v316_v52 }
 0x35a   :  { %500 = vrot.lane.b32.xlu0 %v213_v23, %s1462_s29 }
 0x35e   :  { %582 = vperm.xlu0 %1357, %v1516_v6  }
 0x3a4   :  { %v482_v53 = vpop.xlane.xlu0 %481 }
 0x3a5   :  { %v483_v54 = vmax.f32 %v482_v53, 0.0 }
 0x3a7   :  { %v484_v55 = vsel %vm229_vm8, %v483_v54, %v482_v53  ;;  %v31_v54 = vld [vmem:[%s1713_s1 + $0x10] sm:$0xff] }
 0x3a8   :  { %v485_v56 = vsub.f32 %v479_v42, %v484_v55  ;;  %v491_v12 = vmax.f32 %v484_v55, 0.0  ;;  %v32_v55 = vld [vmem:[%s1713_s1 + $0x18] sm:$0xff] }
 0x3aa   :  { %v486_v57 = vmul.f32 1.442695, %v485_v56  ;;  %v492_v13 = vsub.f32 0.0, %v491_v12 }
 0x3ac   :  { %1365 = vpow2.f32 %v486_v57  ;;  %v493_v15 = vmul.f32 1.442695, %v492_v13 }
 0x3ad   :  { %1367 = vpow2.f32 %v321_v62 }
 0x3b6   :  { %v1366_v58 = vpop.eup %1365 }
 0x3b7   :  { %v488_v60 = vsel %vm132_vm2, %v1366_v58, 0.0  ;;  %v1368_v63 = vpop.eup %1367 }
 0x3b8   :  { %489 = vadd.xlane.f32.xlu1 %v488_v60  ;;  %v323_v2 = vmul.f32 %v1368_v63, %v228_v45 }
 0x3d1   :  { %v318_v3 = vpop.xlane.xlu0 %317 }
 0x3d2   :  { %v324_v4 = vadd.f32 %v323_v2, %v318_v3 }
 0x3d4   :  { %1369 = vrcp.f32 %v324_v4 }
 0x3d5   :  { %v501_v11 = vpop.permute.xlu0 %500  ;;  %1371 = vpow2.f32 %v493_v15 }
 0x3dd   :  { %v583_v30 = vpop.permute.xlu0 %582 }
 0x3de   :  { %v1370_v5 = vpop.eup %1369 }
 0x3df   :  { %v326_v10 = vmul.f32 %v1370_v5, %v1364_v51  ;;  %v1372_v16 = vpop.eup %1371 }
 0x3e0   :  { %v495_v17 = vmul.f32 %v1372_v16, %v228_v45  ;;  %v1469_v16 = vmov 3  }
 0x3e1   :  { %1260 = vmatmul.mubr.msk.f32.vlgmr.msra.gmra.mrb[2].mxu0 %vm132_vm2, %v326_v10  ;;  %1359 = vset.pattern.permute.xlu1 %v1469_v16 }
 0x3e2   :  { %1268 = vmatpush3.msra.mxu0 %v501_v11  ;;  %1269 = vmatprep.mubr.msk.f32.mxu0 %vm1459_vm0, %v1460_v1 }
 0x3e3   :  { %1358 = vset.pattern.permute.xlu0 %v1469_v16 }
 0x445   :  { %v490_v18 = vpop.xlane.xlu1 %489 }
 0x446   :  { %v496_v19 = vadd.f32 %v495_v17, %v490_v18  ;;  %v36_v17 = vld [vmem:[%s1714_s2 + $0x18] sm:$0xff]  ;;  %v35_v18 = vld [vmem:[%s1714_s2 + $0x10] sm:$0xff] }
 0x448   :  { %1373 = vrcp.f32 %v496_v19 }
 0x452   :  { %v1374_v20 = vpop.eup %1373 }
 0x453   :  { %v498_v21 = vmul.f32 %v1374_v20, %v1366_v58 }
 0x455   :  { %1270 = vmatmul.mubr.msk.f32.vlgmr.msra.gmra.mrb[4].mxu0 %vm132_vm2, %v498_v21 }
 0x4b4   :  { %v396_v22 = vpop.f32.mrb[2].mxu0 }
 0x4b5   :  { %v1261_v23 = vpop.f32.mrb[3].mxu0 }
 0x528   :  { %v572_v25 = vpop.f32.mrb[4].mxu0 }
 0x529   :  { %577 = vrot.lane.b32.xlu1 %v572_v25, %s1465_s7  ;;  %v1271_v26 = vpop.f32.mrb[5].mxu0 }
 0x52d   :  { %585 = vrot.lane.b32.xlu1 %v1529_v8, %s1466_s8 }
 0x59b   :  { %v578_v27 = vpop.permute.xlu1 %577 }
 0x59c   :  { %v580_v28 = vsel %vm44_vm1, %v396_v22, %v578_v27 }
 0x59d   :  { %1273 = vmatpush3.msra.mxu1 %v580_v28 }
 0x59e   :  { %1304 = vmatprep.subr.bf16.mxu1 %v1458_v0 }
 0x59f   :  { %v586_v29 = vpop.permute.xlu1 %585 }
 0x5a0   :  { %1275 = vmatmul.mubr.msk.f32.vlgmr.msra.gmra.mrb[6].mxu1 %vm132_vm2, %v586_v29 }
 0x5a1   :  { %1293 = vmatprep.mubr.msk.f32.mxu1 %vm1459_vm0, %v1460_v1 }
 0x673   :  { %v655_v31 = vpop.f32.mrb[6].mxu1 }
 0x674   :  { %v656_v32 = vadd.f32 %v655_v31, %v583_v30  ;;  %v1276_v33 = vpop.f32.mrb[7].mxu1 }
 0x675   :  { %v1471_v33 = vmov 4  }
 0x676   :  { %v1596_v34 = vadd.f32 %v656_v32, %v1546_v14 }
 0x678   :  { %v660_v35 = vsel %vm44_vm1, %v1596_v34, 0.0  ;;  %v670_v36 = vmul.f32 %v1596_v34, %v1596_v34 }
 0x679   :  { %661 = vadd.xlane.f32.xlu1 %v660_v35 }
 0x67a   :  { %v671_v37 = vsel %vm44_vm1, %v670_v36, 0.0 }
 0x67b   :  { %672 = vadd.xlane.f32.xlu0 %v671_v37 }
 0x68a   :  { %695 = vrot.lane.b32.xlu1 %v1596_v34, %s1462_s29 }
 0x691   :  { %709 = vrot.lane.b32.xlu0 %v670_v36, %s1462_s29 }
 0x706   :  { %v662_v1 = vpop.xlane.xlu1 %661 }
 0x707   :  { %v663_v38 = vrot.slane %v662_v1, 4 }
 0x708   :  { %v673_v39 = vpop.xlane.xlu0 %672 }
 0x709   :  { %v664_v14 = vadd.f32 %v663_v38, %v662_v1  ;;  %v674_v40 = vrot.slane %v673_v39, 4 }
 0x70a   :  { %v696_v41 = vpop.permute.xlu1 %695 }
 0x70b   :  { %v665_v42 = vrot.slane %v664_v14, 2  ;;  %v675_v43 = vadd.f32 %v674_v40, %v673_v39  ;;  %v698_v44 = vsel %vm44_vm1, %v696_v41, 0.0 }
 0x70c   :  { %v710_v45 = vpop.permute.xlu0 %709  ;;  %699 = vadd.xlane.f32.xlu1 %v698_v44 }
 0x70d   :  { %v676_v46 = vrot.slane %v675_v43, 2  ;;  %v712_v47 = vsel %vm44_vm1, %v710_v45, 0.0  ;;  %v666_v48 = vadd.f32 %v665_v42, %v664_v14 }
 0x70e   :  { %713 = vadd.xlane.f32.xlu0 %v712_v47 }
 0x70f   :  { %v667_v49 = vrot.slane %v666_v48, 1  ;;  %v677_v50 = vadd.f32 %v676_v46, %v675_v43 }
 0x711   :  { %v668_v51 = vadd.f32 %v667_v49, %v666_v48  ;;  %v678_v52 = vrot.slane %v677_v50, 1 }
 0x713   :  { %1310 = vpush %v668_v51  ;;  %v679_v53 = vadd.f32 %v678_v52, %v677_v50 }
 0x715   :  { %1312 = vpush %v679_v53 }
 0x71d   :  { %756 = vrot.lane.b32.xlu1 %v1529_v8, %s1467_s9 }
 0x721   :  { %760 = vrot.lane.b32.xlu1 %v31_v54, %s1467_s9 }
 0x724   :  { %758 = vrot.lane.b32.xlu0 %v1521_v7, %s1467_s9 }
 0x725   :  { %762 = vrot.lane.b32.xlu1 %v32_v55, %s1467_s9 }
 0x728   :  { %737 = vperm.xlu0 %1358, %v1516_v6  }
 0x729   :  { %741 = vperm.xlu1 %1359, %v1541_v9  }
 0x72c   :  { %751 = vperm.xlu0 %1358, %v36_v17  }
 0x72d   :  { %746 = vperm.xlu1 %1359, %v35_v18  }
 0x730   :  { %1360 = vset.pattern.permute.xlu0 %v1471_v33 }
 0x731   :  { %929 = vrot.lane.b32.xlu1 %v1529_v8, %s1470_s0  ;;  %926 = vperm.xlu0 %1360, %v1516_v6  }
 0x744   :  { %s1311_s14 = spop %1310 }
 0x745   :  { %s1616_s15 = smul.f32 0.0078125, %s1311_s14 }
 0x746   :  { %s1313_s16 = spop %1312 }
 0x747   :  { %s683_s17 = smul.f32 %s1616_s15, %s1616_s15  ;;  %v686_v21 = vstv %s1616_s15 }
 0x748   :  { %s682_s18 = smul.f32 0.0078125, %s1313_s16  ;;  %v687_v24 = vsub.f32 %v1596_v34, %v686_v21 }
 0x74a   :  { %s684_s19 = ssub.f32 %s682_s18, %s683_s17 }
 0x74c   :  { %s685_s21 = smax.f32 %s1468_s20, %s684_s19 }
 0x74d   :  { %s688_s24 = sadd.f32 1e-05, %s685_s21 }
 0x74f   :  { %v689_v56 = vstv %s688_s24 }
 0x750   :  { %1375 = vrsqrt.f32 %v689_v56 }
 0x75a   :  { %v1376_v57 = vpop.eup %1375 }
 0x75b   :  { %1314 = vpush %v1376_v57 }
 0x78c   :  { %s1315_s28 = spop %1314 }
 0x78d   :  { %v692_v23 = vstv %s1315_s28 }
 0x78e   :  { %v693_v27 = vmul.f32 %v692_v23, %v687_v24 }
 0x799   :  { %v700_v58 = vpop.xlane.xlu1 %699 }
 0x79a   :  { %v701_v59 = vrot.slane %v700_v58, 4 }
 0x79b   :  { %v714_v60 = vpop.xlane.xlu0 %713 }
 0x79c   :  { %v702_v61 = vadd.f32 %v701_v59, %v700_v58  ;;  %v715_v62 = vrot.slane %v714_v60, 4 }
 0x79d   :  { %v757_v5 = vpop.permute.xlu1 %756 }
 0x79e   :  { %v703_v63 = vrot.slane %v702_v61, 2  ;;  %v716_v2 = vadd.f32 %v715_v62, %v714_v60  ;;  %1279 = vmatprep.mubr.msk.f32.mxu0 %vm132_vm2, %v757_v5 }
 0x79f   :  { %v759_v31 = vpop.permute.xlu0 %758 }
 0x7a0   :  { %v717_v3 = vrot.slane %v716_v2, 2  ;;  %v704_v4 = vadd.f32 %v703_v63, %v702_v61 }
 0x7a1   :  { %v761_v29 = vpop.permute.xlu1 %760 }
 0x7a2   :  { %v705_v10 = vrot.slane %v704_v4, 1  ;;  %v718_v11 = vadd.f32 %v717_v3, %v716_v2 }
 0x7a4   :  { %v706_v12 = vadd.f32 %v705_v10, %v704_v4  ;;  %v719_v13 = vrot.slane %v718_v11, 1 }
 0x7a5   :  { %v763_v32 = vpop.permute.xlu1 %762 }
 0x7a6   :  { %1316 = vpush %v706_v12  ;;  %v720_v15 = vadd.f32 %v719_v13, %v718_v11 }
 0x7a8   :  { %1318 = vpush %v720_v15 }
 0x7a9   :  { %v742_v35 = vpop.permute.xlu1 %741 }
 0x7ad   :  { %v747_v43 = vpop.permute.xlu1 %746 }
 0x7d7   :  { %s1317_s30 = spop %1316 }
 0x7d8   :  { %s722_s4 = smul.f32 0.0078125, %s1317_s30 }
 0x7d9   :  { %s1319_s5 = spop %1318 }
 0x7da   :  { %s724_s6 = smul.f32 %s722_s4, %s722_s4  ;;  %v727_v22 = vstv %s722_s4 }
 0x7db   :  { %s723_s7 = smul.f32 0.0078125, %s1319_s5  ;;  %v728_v25 = vsub.f32 %v1596_v34, %v727_v22  ;;  %v738_v34 = vpop.permute.xlu0 %737 }
 0x7dd   :  { %s725_s8 = ssub.f32 %s723_s7, %s724_s6 }
 0x7df   :  { %s726_s9 = smax.f32 %s1468_s20, %s725_s8  ;;  %v752_v14 = vpop.permute.xlu0 %751 }
 0x7e0   :  { %s729_s10 = sadd.f32 1e-05, %s726_s9 }
 0x7e2   :  { %v730_v19 = vstv %s729_s10 }
 0x7e3   :  { %1377 = vrsqrt.f32 %v730_v19 }
 0x7ed   :  { %v1378_v20 = vpop.eup %1377 }
 0x7ee   :  { %1320 = vpush %v1378_v20 }
 0x81f   :  { %s1321_s2 = spop %1320 }
 0x820   :  { %v733_v26 = vstv %s1321_s2 }
 0x821   :  { %v734_v28 = vmul.f32 %v733_v26, %v728_v25 }
 0x823   :  { %v1636_v30 = vsel %vm44_vm1, %v693_v27, %v734_v28 }
 0x824   :  { %1277 = vmatprep.subr.mxu0 %v1636_v30 }
 0x825   :  { %1278 = vmatpush3.msra.mxu0 %v1636_v30 }
 0x826   :  { %1280 = vmatmul.mubr.msk.f32.vlgmr.msra.gmra.mrb[6].mxu0 %vm132_vm2, %v759_v31 }
 0x827   :  { %1282 = vmatprep.mubr.msk.f32.mxu0 %vm132_vm2, %v761_v29 }
 0x82a   :  { %1283 = vmatmul.mubr.msk.f32.gmra.mrb[8].mxu0 %vm132_vm2, %v763_v32 }
 0x8f9   :  { %v1281_v36 = vpop.f32.mrb[6].mxu0 }
 0x8fa   :  { %v1644_v37 = vadd.f32 %v1281_v36, %v742_v35  ;;  %v838_v1 = vpop.f32.mrb[7].mxu0 }
 0x8fb   :  { %v1646_v38 = vadd.f32 %v838_v1, %v738_v34 }
 0x8fc   :  { %v862_v39 = vand.u32 2147483647, %v1644_v37  ;;  %v858_v16 = vmax.f32 %v1644_v37, 0.0 }
 0x8fd   :  { %v861_v40 = vand.u32 2147483647, %v1646_v38  ;;  %v1284_v41 = vpop.f32.mrb[8].mxu0  ;;  %v857_v26 = vmax.f32 %v1646_v38, 0.0 }
 0x8fe   :  { %v866_v42 = vsub.f32 0.0, %v862_v39  ;;  %v1650_v44 = vadd.f32 %v1284_v41, %v752_v14  ;;  %v848_v45 = vpop.f32.mrb[9].mxu0 }
 0x8ff   :  { %v865_v46 = vsub.f32 0.0, %v861_v40  ;;  %v1652_v47 = vadd.f32 %v848_v45, %v747_v43 }
 0x900   :  { %v871_v48 = vmul.f32 1.442695, %v866_v42  ;;  %v864_v49 = vand.u32 2147483647, %v1650_v44  ;;  %v860_v34 = vmax.f32 %v1650_v44, 0.0 }
 0x901   :  { %v869_v50 = vmul.f32 1.442695, %v865_v46  ;;  %v863_v51 = vand.u32 2147483647, %v1652_v47  ;;  %v859_v40 = vmax.f32 %v1652_v47, 0.0 }
 0x902   :  { %1379 = vpow2.f32 %v871_v48  ;;  %v868_v52 = vsub.f32 0.0, %v864_v49 }
 0x903   :  { %1381 = vpow2.f32 %v869_v50  ;;  %v867_v53 = vsub.f32 0.0, %v863_v51 }
 0x904   :  { %v875_v54 = vmul.f32 1.442695, %v868_v52 }
 0x905   :  { %v873_v55 = vmul.f32 1.442695, %v867_v53 }
 0x906   :  { %1383 = vpow2.f32 %v875_v54 }
 0x907   :  { %1385 = vpow2.f32 %v873_v55 }
 0x90c   :  { %v1380_v56 = vpop.eup %1379 }
 0x90d   :  { %v1382_v57 = vpop.eup %1381  ;;  %v886_v58 = vadd.f32 1.0, %v1380_v56  ;;  %v889_v63 = vmul.f32 -0.5, %v1380_v56  ;;  %v892_v5 = vand.u32 2147483647, %v1380_v56 }
 0x90e   :  { %v877_v59 = vadd.f32 1.0, %v1382_v57  ;;  %v880_v3 = vmul.f32 -0.5, %v1382_v57  ;;  %v883_v13 = vand.u32 2147483647, %v1382_v57 }
 0x90f   :  { %1387 = vlog2.f32 %v886_v58  ;;  %v890_v4 = vadd.f32 1.0, %v889_v63  ;;  %vm893_vm9 = vcmp.lt.f32.partialorder %v892_v5, 0.0004427343 }
 0x910   :  { %v1384_v60 = vpop.eup %1383  ;;  %1389 = vlog2.f32 %v877_v59  ;;  %v881_v11 = vadd.f32 1.0, %v880_v3  ;;  %vm884_vm10 = vcmp.lt.f32.partialorder %v883_v13, 0.0004427343 }
 0x911   :  { %v1386_v61 = vpop.eup %1385  ;;  %v904_v62 = vadd.f32 1.0, %v1384_v60  ;;  %v907_v10 = vmul.f32 -0.5, %v1384_v60  ;;  %v891_v19 = vmul.f32 %v1380_v56, %v890_v4  ;;  %v910_v23 = vand.u32 2147483647, %v1384_v60  ;;  %v930_v56 = vpop.permute.xlu1 %929 }
 0x912   :  { %v895_v2 = vadd.f32 1.0, %v1386_v61  ;;  %v898_v12 = vmul.f32 -0.5, %v1386_v61  ;;  %v882_v22 = vmul.f32 %v1382_v57, %v881_v11  ;;  %v901_v27 = vand.u32 2147483647, %v1386_v61  ;;  %v927_v57 = vpop.permute.xlu0 %926 }
 0x913   :  { %1391 = vlog2.f32 %v904_v62  ;;  %v908_v20 = vadd.f32 1.0, %v907_v10  ;;  %vm911_vm11 = vcmp.lt.f32.partialorder %v910_v23, 0.0004427343 }
 0x914   :  { %1393 = vlog2.f32 %v895_v2  ;;  %v899_v24 = vadd.f32 1.0, %v898_v12  ;;  %vm902_vm12 = vcmp.lt.f32.partialorder %v901_v27, 0.0004427343 }
 0x915   :  { %v909_v36 = vmul.f32 %v1384_v60, %v908_v20 }
 0x916   :  { %v900_v39 = vmul.f32 %v1386_v61, %v899_v24 }
 0x919   :  { %v1388_v15 = vpop.eup %1387 }
 0x91a   :  { %v1390_v17 = vpop.eup %1389  ;;  %v888_v18 = vmul.f32 0.6931472, %v1388_v15 }
 0x91b   :  { %v879_v21 = vmul.f32 0.6931472, %v1390_v17 }
 0x91c   :  { %v894_v25 = vsel %vm893_vm9, %v891_v19, %v888_v18 }
 0x91d   :  { %v1392_v28 = vpop.eup %1391  ;;  %v914_v29 = vadd.f32 %v894_v25, %v858_v16  ;;  %v885_v31 = vsel %vm884_vm10, %v882_v22, %v879_v21 }
 0x91e   :  { %v1394_v32 = vpop.eup %1393  ;;  %v913_v33 = vadd.f32 %v885_v31, %v857_v26  ;;  %v906_v35 = vmul.f32 0.6931472, %v1392_v28 }
 0x91f   :  { %1395 = vtanh.f32 %v914_v29  ;;  %v897_v1 = vmul.f32 0.6931472, %v1394_v32 }
 0x920   :  { %1397 = vtanh.f32 %v913_v33  ;;  %v912_v14 = vsel %vm911_vm11, %v909_v36, %v906_v35  ;;  %v1473_v36 = vmov 5  }
 0x921   :  { %v916_v41 = vadd.f32 %v912_v14, %v860_v34  ;;  %v903_v42 = vsel %vm902_vm12, %v900_v39, %v897_v1  ;;  %1361 = vset.pattern.permute.xlu1 %v1473_v36  ;;  %1362 = vset.pattern.permute.xlu0 %v1473_v36 }
 0x922   :  { %v915_v43 = vadd.f32 %v903_v42, %v859_v40 }
 0x923   :  { %1399 = vtanh.f32 %v916_v41 }
 0x924   :  { %1401 = vtanh.f32 %v915_v43 }
 0x929   :  { %v1396_v45 = vpop.eup %1395 }
 0x92a   :  { %v1398_v46 = vpop.eup %1397  ;;  %v922_v48 = vmul.f32 %v1396_v45, %v1644_v37 }
 0x92b   :  { %v921_v49 = vmul.f32 %v1398_v46, %v1646_v38 }
 0x92d   :  { %v1400_v50 = vpop.eup %1399  ;;  %v1305_v51 = vpack.c.bf16 %v922_v48, %v921_v49 }
 0x92e   :  { %v1402_v52 = vpop.eup %1401  ;;  %v924_v53 = vmul.f32 %v1400_v50, %v1650_v44 }
 0x92f   :  { %v923_v54 = vmul.f32 %v1402_v52, %v1652_v47  ;;  %1306 = vmatpush3.bf16.msra.mxu1 %v1305_v51 }
 0x930   :  { %1307 = vmatprep.subr.bf16.mxu1 %v1458_v0 }
 0x931   :  { %v1308_v55 = vpack.c.bf16 %v924_v53, %v923_v54 }
 0x933   :  { %1309 = vmatpush3.bf16.msra.mxu1 %v1308_v55 }
 0x936   :  { %1294 = vmatmul.mubr.msk.f32.vlgmr.msra.gmra.mrb[8].mxu1 %vm931_vm13, %v930_v56 }
 0xa09   :  { %v1000_v37 = vpop.f32.mrb[8].mxu1 }
 0xa0a   :  { %v1001_v58 = vadd.f32 %v1000_v37, %v927_v57  ;;  %v1295_v38 = vpop.f32.mrb[9].mxu1 }
 0xa0c   :  { %v1667_v59 = vadd.f32 %v1001_v58, %v1636_v30 }
 0xa0e   :  { %v1005_v44 = vsel %vm44_vm1, %v1667_v59, 0.0  ;;  %v1015_v47 = vmul.f32 %v1667_v59, %v1667_v59 }
 0xa0f   :  { %1006 = vadd.xlane.f32.xlu1 %v1005_v44 }
 0xa10   :  { %v1016_v0 = vsel %vm44_vm1, %v1015_v47, 0.0 }
 0xa11   :  { %1017 = vadd.xlane.f32.xlu0 %v1016_v0 }
 0xa20   :  { %1040 = vrot.lane.b32.xlu1 %v1667_v59, %s1462_s29 }
 0xa27   :  { %1054 = vrot.lane.b32.xlu0 %v1015_v47, %s1462_s29  ;;  %s1472_s29 = smov 56  }
 0xa9c   :  { %v1007_v60 = vpop.xlane.xlu1 %1006 }
 0xa9d   :  { %v1008_v61 = vrot.slane %v1007_v60, 4 }
 0xa9e   :  { %v1018_v62 = vpop.xlane.xlu0 %1017 }
 0xa9f   :  { %v1009_v30 = vadd.f32 %v1008_v61, %v1007_v60  ;;  %v1019_v63 = vrot.slane %v1018_v62, 4 }
 0xaa0   :  { %v1041_v2 = vpop.permute.xlu1 %1040 }
 0xaa1   :  { %v1010_v3 = vrot.slane %v1009_v30, 2  ;;  %v1020_v4 = vadd.f32 %v1019_v63, %v1018_v62  ;;  %v1043_v5 = vsel %vm44_vm1, %v1041_v2, 0.0 }
 0xaa2   :  { %v1055_v10 = vpop.permute.xlu0 %1054  ;;  %1044 = vadd.xlane.f32.xlu1 %v1043_v5 }
 0xaa3   :  { %v1021_v11 = vrot.slane %v1020_v4, 2  ;;  %v1057_v12 = vsel %vm44_vm1, %v1055_v10, 0.0  ;;  %v1011_v13 = vadd.f32 %v1010_v3, %v1009_v30 }
 0xaa4   :  { %1058 = vadd.xlane.f32.xlu0 %v1057_v12 }
 0xaa5   :  { %v1012_v15 = vrot.slane %v1011_v13, 1  ;;  %v1022_v16 = vadd.f32 %v1021_v11, %v1020_v4 }
 0xaa7   :  { %v1013_v17 = vadd.f32 %v1012_v15, %v1011_v13  ;;  %v1023_v18 = vrot.slane %v1022_v16, 1 }
 0xaa9   :  { %1322 = vpush %v1013_v17  ;;  %v1024_v19 = vadd.f32 %v1023_v18, %v1022_v16 }
 0xaab   :  { %1324 = vpush %v1024_v19 }
 0xab3   :  { %1089 = vrot.lane.b32.xlu1 %v1529_v8, %s1472_s29 }
 0xab7   :  { %1082 = vperm.xlu1 %1361, %v1516_v6  }
 0xaba   :  { %1091 = vrot.lane.b32.xlu0 %v1521_v7, %s1472_s29 }
 0xabb   :  { %1086 = vperm.xlu1 %1361, %v1541_v9  }
 0xada   :  { %s1323_s11 = spop %1322 }
 0xadb   :  { %s1681_s12 = smul.f32 0.0078125, %s1323_s11 }
 0xadc   :  { %s1325_s13 = spop %1324 }
 0xadd   :  { %s1028_s14 = smul.f32 %s1681_s12, %s1681_s12  ;;  %v1031_v14 = vstv %s1681_s12 }
 0xade   :  { %s1027_s15 = smul.f32 0.0078125, %s1325_s13  ;;  %v1032_v6 = vsub.f32 %v1667_v59, %v1031_v14 }
 0xae0   :  { %s1029_s16 = ssub.f32 %s1027_s15, %s1028_s14 }
 0xae2   :  { %s1030_s17 = smax.f32 %s1468_s20, %s1029_s16 }
 0xae3   :  { %s1033_s18 = sadd.f32 1e-05, %s1030_s17 }
 0xae5   :  { %v1034_v20 = vstv %s1033_s18 }
 0xae6   :  { %1403 = vrsqrt.f32 %v1034_v20 }
 0xaf0   :  { %v1404_v21 = vpop.eup %1403 }
 0xaf1   :  { %1326 = vpush %v1404_v21 }
 0xb22   :  { %s1327_s19 = spop %1326 }
 0xb23   :  { %v1037_v41 = vstv %s1327_s19 }
 0xb24   :  { %v1038_v43 = vmul.f32 %v1037_v41, %v1032_v6 }
 0xb2f   :  { %v1045_v22 = vpop.xlane.xlu1 %1044 }
 0xb30   :  { %v1046_v8 = vrot.slane %v1045_v22, 4 }
 0xb31   :  { %v1059_v23 = vpop.xlane.xlu0 %1058 }
 0xb32   :  { %v1047_v7 = vadd.f32 %v1046_v8, %v1045_v22  ;;  %v1060_v24 = vrot.slane %v1059_v23, 4 }
 0xb33   :  { %v1090_v34 = vpop.permute.xlu1 %1089 }
 0xb34   :  { %v1048_v25 = vrot.slane %v1047_v7, 2  ;;  %v1061_v26 = vadd.f32 %v1060_v24, %v1059_v23  ;;  %1298 = vmatprep.mubr.msk.f32.mxu0 %vm132_vm2, %v1090_v34 }
 0xb35   :  { %v1092_v48 = vpop.permute.xlu0 %1091 }
 0xb36   :  { %v1062_v27 = vrot.slane %v1061_v26, 2  ;;  %v1049_v28 = vadd.f32 %v1048_v25, %v1047_v7 }
 0xb37   :  { %v1083_v49 = vpop.permute.xlu1 %1082 }
 0xb38   :  { %v1050_v29 = vrot.slane %v1049_v28, 1  ;;  %v1063_v31 = vadd.f32 %v1062_v27, %v1061_v26 }
 0xb3a   :  { %v1051_v32 = vadd.f32 %v1050_v29, %v1049_v28  ;;  %v1064_v33 = vrot.slane %v1063_v31, 1 }
 0xb3b   :  { %v1087_v51 = vpop.permute.xlu1 %1086 }
 0xb3c   :  { %1328 = vpush %v1051_v32  ;;  %v1065_v35 = vadd.f32 %v1064_v33, %v1063_v31 }
 0xb3e   :  { %1330 = vpush %v1065_v35 }
 0xb6d   :  { %s1329_s21 = spop %1328 }
 0xb6e   :  { %s1067_s24 = smul.f32 0.0078125, %s1329_s21 }
 0xb6f   :  { %s1331_s1 = spop %1330 }
 0xb70   :  { %s1069_s25 = smul.f32 %s1067_s24, %s1067_s24  ;;  %v1072_v40 = vstv %s1067_s24 }
 0xb71   :  { %s1068_s26 = smul.f32 0.0078125, %s1331_s1  ;;  %v1073_v9 = vsub.f32 %v1667_v59, %v1072_v40 }
 0xb73   :  { %s1070_s27 = ssub.f32 %s1068_s26, %s1069_s25 }
 0xb75   :  { %s1071_s0 = smax.f32 %s1468_s20, %s1070_s27  ;;  %s1474_s20 = smov [#allocation5]  }
 0xb76   :  { %s1074_s28 = sadd.f32 1e-05, %s1071_s0  ;;  %s1179_s4 = sshll.u32 %s1474_s20, 4  ;;  %s1180_s4 = int_to_ptr.vmem [resolvable:$true] %s1179_s4 }
 0xb77   :  { %s1429_s5 = scalar_lea.vmem %s1180_s4, 256  ;;  %p1434_p9 = scmp.lt.s32.totalorder %s1180_s4, %s1180_s4 }
 0xb78   :  { %v1075_v1 = vstv %s1074_s28  ;;  %p1430_p8 = scmp.ne.s32.totalorder %s1180_s4, %s1429_s5  ;;  %p1435_p10 = scmp.lt.s32.totalorder %s1429_s5, %s1429_s5 }
 0xb79   :  { %1405 = vrsqrt.f32 %v1075_v1 }
 0xb7a   :  { %p1436_p11 = por %p1435_p10, %p1434_p9 }
 0xb7c   :  { %p1437_p12 = pnand %p1436_p11, %p1430_p8 }
 0xb83   :  { %v1406_v39 = vpop.eup %1405 }
 0xb84   :  { %1332 = vpush %v1406_v39 }
 0xbb5   :  { %s1333_s30 = spop %1332 }
 0xbb6   :  { %v1078_v42 = vstv %s1333_s30 }
 0xbb7   :  { %v1079_v45 = vmul.f32 %v1078_v42, %v1073_v9 }
 0xbb9   :  { %v1080_v46 = vsel %vm44_vm1, %v1038_v43, %v1079_v45 }
 0xbba   :  { %1296 = vmatprep.subr.mxu0 %v1080_v46 }
 0xbbb   :  { %1297 = vmatpush3.msra.mxu0 %v1080_v46 }
 0xbbc   :  { %1299 = vmatmul.mubr.msk.f32.vlgmr.msra.gmra.mrb[10].mxu0 %vm132_vm2, %v1092_v48 }
 0xc8f   :  { %v1300_v50 = vpop.f32.mrb[10].mxu0 }
 0xc90   :  { %v1163_v52 = vpop.f32.mrb[11].mxu0  ;;  %v1169_v53 = vadd.f32 %v1300_v50, %v1087_v51 }
 0xc91   :  { %v1164_v54 = vadd.f32 %v1163_v52, %v1083_v49 }
 0xc92   :  { %1173 = vst.msk [vmem:[#allocation5 + $0x8] sm:$0xff] %vm931_vm13, %v1169_v53 }
 0xc93   :  { %1172 = vst.msk [vmem:[#allocation5] sm:$0xff] %vm931_vm13, %v1164_v54 }
 0xc94   :  { %1440 = shalt.err (!%p1437_p12)
}
 0xc95   :  { %s1441_s8 = scalar_lea.hbm %s1715_s3, 256 }
 0xc96   :  { %p1442_p13 = scmp.ne.s32.totalorder %s1715_s3, %s1441_s8  ;;  %p1445_p0 = scmp.lt.u32.totalorder %s1441_s8, %s1715_s3 }
 0xc98   :  { %p1447_p1 = pnand %p1445_p0, %p1442_p13 }
 0xc9a   :  { %1450 = shalt.err (!%p1447_p1)
}
 0xc9b   :  { %1185 = dma.vmem_to_hbm [thread:$0]  %s1180_s4, 256, %s1715_s3, [#allocation4], %s1456_s22, %s1456_s22, %s1457_s23  }
 0xc9c   :  { %1453 = dma.done.wait [#allocation4], 256  }
 0xc9d   :  { %1454 = vsyncadd [#allocation4], 4294967040 }
 0xc9e   :  { %1189 = vsyncpa [#allocation3], 1 }
 0xc9f   :  { %1190 = vsyncpa [#allocation4], 1 }

</bundles_post_ra>
